<compile_context>
chip_gen: v7x
topology: tpu7x:2x2x1
jax: 0.10.0
libtpu: 0.0.40
codegen_flags: <defaults>
</compile_context>

<pallas_src>
import functools

import jax
import jax.numpy as jnp
import numpy as np
from jax.experimental import pallas as pl
from jax.experimental.pallas import tpu as pltpu


def _round_up(x, m):
    return ((x + m - 1) // m) * m


def _choose_tile(n):
    # 1024-node tiles amortize per-grid-step overhead and halve redundant
    # XW re-DMAs vs 512; tiny graphs use the smallest 128-multiple covering N.
    return min(1024, _round_up(n, 128))


def build_adjacency(src, dst, n, tile=None):
    """Dense adjacency A[dst, src] = edge multiplicity, built once at graph
    construction time: already zero-padded to a multiple of the node tile and
    stored in bf16 (exact for edge multiplicities <= 256), so the per-call
    forward never re-pads / re-copies the O(N^2) matrix."""
    if tile is None:
        tile = _choose_tile(n)
    n_pad = _round_up(n, tile)
    a = np.zeros((n_pad, n_pad), dtype=np.float32)
    np.add.at(a, (np.asarray(dst, dtype=np.int64), np.asarray(src, dtype=np.int64)), 1.0)
    # TODO(synk): edge multiplicities > 256 are not exactly representable in
    #             bf16; such multigraphs should keep the adjacency in f32.
    return jnp.asarray(a, dtype=jnp.bfloat16), tile


# ----------------------------------------------------------------------------
# Kernel 1: feature transform  XW = X @ W^T   (f32 in, bf16 lane-dense out)
# ----------------------------------------------------------------------------
def transform_kernel(x_ref, wt_ref, o_ref):
    o_ref[...] = jnp.dot(
        x_ref[...], wt_ref[...], preferred_element_type=jnp.float32
    ).astype(o_ref.dtype)


# ----------------------------------------------------------------------------
# Kernel 2a: aggregation + bias, XW resident in VMEM (loaded once per call).
# ----------------------------------------------------------------------------
def aggregate_resident_kernel(adj_ref, xw_ref, b_ref, o_ref, acc_ref, *, tk):
    k = pl.program_id(1)

    @pl.when(k == 0)
    def _():
        acc_ref[...] = jnp.zeros_like(acc_ref)

    start = pl.multiple_of(k * tk, tk)
    acc_ref[...] += jnp.dot(
        adj_ref[...], xw_ref[pl.ds(start, tk), :],
        preferred_element_type=jnp.float32,
    )

    @pl.when(k == pl.num_programs(1) - 1)
    def _():
        # Bias only in the finalize branch (not re-added every k step).
        o_ref[...] = (acc_ref[...] + b_ref[...]).astype(o_ref.dtype)


# ----------------------------------------------------------------------------
# Kernel 2b: aggregation + bias, XW streamed per-k tile (fallback, huge N).
# ----------------------------------------------------------------------------
def aggregate_tiled_kernel(adj_ref, xw_ref, b_ref, o_ref, acc_ref):
    k = pl.program_id(1)

    @pl.when(k == 0)
    def _():
        acc_ref[...] = jnp.zeros_like(acc_ref)

    acc_ref[...] += jnp.dot(
        adj_ref[...], xw_ref[...], preferred_element_type=jnp.float32
    )

    @pl.when(k == pl.num_programs(1) - 1)
    def _():
        o_ref[...] = (acc_ref[...] + b_ref[...]).astype(o_ref.dtype)


_XW_RESIDENT_LIMIT_BYTES = 8 << 20  # keep 2x-buffered resident XW well inside VMEM


def gcn_layer_forward(adj_pad, x, w, b, *, tile=None):
    """GCN layer forward: Y = A @ (X @ W^T) + b.

    adj_pad: [N_pad, N_pad] bf16 dense adjacency, pre-padded (build_adjacency).
    x: [N, Fin]; w: [Fout, Fin]; b: [Fout] or [1, Fout].  Returns [N, Fout].
    """
    n, fin = x.shape
    fout = w.shape[0]
    n_pad = adj_pad.shape[0]
    if tile is None:
        tile = _choose_tile(n)
    assert n_pad % tile == 0 and n_pad >= n
    tm = tk = tile

    fout_pad = _round_up(fout, 128)  # lane-dense XW intermediate and output
    f32 = jnp.float32
    b = b.reshape(1, -1)

    # Only O(N*F) pads here -- the O(N^2) adjacency arrives already padded.
    x_p = jnp.pad(x.astype(f32), ((0, n_pad - n), (0, 0)))
    wt_p = jnp.pad(w.astype(f32).T, ((0, 0), (0, fout_pad - fout)))
    b_p = jnp.pad(b.astype(f32), ((0, 0), (0, fout_pad - fout)))

    # --- stage 1: XW = X @ W^T  (tiny; Fin unpadded, bf16 lane-dense output) --
    xw = pl.pallas_call(
        transform_kernel,
        out_shape=jax.ShapeDtypeStruct((n_pad, fout_pad), jnp.bfloat16),
        grid=(n_pad // tm,),
        in_specs=[
            pl.BlockSpec((tm, fin), lambda i: (i, 0)),
            pl.BlockSpec((fin, fout_pad), lambda i: (0, 0)),
        ],
        out_specs=pl.BlockSpec((tm, fout_pad), lambda i: (i, 0)),
        compiler_params=pltpu.CompilerParams(
            dimension_semantics=("parallel",)
        ),
        cost_estimate=pl.CostEstimate(
            flops=2 * n_pad * fin * fout_pad,
            transcendentals=0,
            bytes_accessed=4 * n_pad * fin + 4 * fin * fout_pad
            + 2 * n_pad * fout_pad,
        ),
    )(x_p, wt_p)

    # --- stage 2: Y = A @ XW + b  (A-bandwidth bound; bf16 A and XW on MXU,
    #     f32 VMEM accumulator, bias added only in the k==last finalize). -----
    xw_bytes = n_pad * fout_pad * 2
    resident = xw_bytes <= _XW_RESIDENT_LIMIT_BYTES

    if resident:
        kernel = functools.partial(aggregate_resident_kernel, tk=tk)
        xw_spec = pl.BlockSpec((n_pad, fout_pad), lambda i, k: (0, 0))
        xw_reads = 1
        xw_buf = 2 * xw_bytes
    else:
        kernel = aggregate_tiled_kernel
        xw_spec = pl.BlockSpec((tk, fout_pad), lambda i, k: (k, 0))
        xw_reads = n_pad // tm
        xw_buf = 2 * tk * fout_pad * 2

    out_itemsize = jnp.dtype(x.dtype).itemsize
    adj_buf = 2 * tm * tk * 2                      # double-buffered bf16 A tiles
    out_buf = 2 * tm * fout_pad * out_itemsize
    acc_buf = tm * fout_pad * 4
    vmem_limit = min(
        max(int(1.5 * (adj_buf + out_buf + acc_buf + xw_buf)) + (4 << 20),
            16 << 20),
        64 << 20,                                  # v7x physical VMEM headroom
    )

    out_p = pl.pallas_call(
        kernel,
        out_shape=jax.ShapeDtypeStruct((n_pad, fout_pad), x.dtype),
        grid=(n_pad // tm, n_pad // tk),
        in_specs=[
            pl.BlockSpec((tm, tk), lambda i, k: (i, k)),
            xw_spec,
            pl.BlockSpec((1, fout_pad), lambda i, k: (0, 0)),
        ],
        out_specs=pl.BlockSpec((tm, fout_pad), lambda i, k: (i, 0)),
        scratch_shapes=[pltpu.VMEM((tm, fout_pad), jnp.float32)],
        compiler_params=pltpu.CompilerParams(
            dimension_semantics=("parallel", "arbitrary"),
            vmem_limit_bytes=vmem_limit,
        ),
        cost_estimate=pl.CostEstimate(
            flops=2 * n_pad * n_pad * fout_pad,
            transcendentals=0,
            bytes_accessed=2 * n_pad * n_pad                   # A (bf16), once
            + 2 * n_pad * fout_pad * xw_reads                  # XW (bf16)
            + out_itemsize * n_pad * fout_pad                  # Y
            + 4 * fout_pad,                                    # bias
        ),
    )(adj_pad, xw, b_p)

    # Slice away padding.
    return out_p[:n, :fout]


if __name__ == "__main__":
    N = 16          # number of graph nodes
    IN_FEATS = 32
    OUT_FEATS = 16

    key = jax.random.PRNGKey(0)
    k_x, k_w, k_b, k_e = jax.random.split(key, 4)

    # Node features.
    x = jax.random.normal(k_x, (N, IN_FEATS), dtype=jnp.float32)

    # Deterministic Linear params (nn.Linear(in_feats, out_feats) shapes),
    # uniform(-1/sqrt(in), 1/sqrt(in)) like PyTorch's default init.
    bound = 1.0 / np.sqrt(IN_FEATS)
    w = jax.random.uniform(k_w, (OUT_FEATS, IN_FEATS), dtype=jnp.float32,
                           minval=-bound, maxval=bound)
    b = jax.random.uniform(k_b, (1, OUT_FEATS), dtype=jnp.float32,
                           minval=-bound, maxval=bound)

    # Deterministic synthetic graph: ring edges + a few random edges.
    src = list(range(N))
    dst = [(i + 1) % N for i in range(N)]
    extra_src = np.asarray(jax.random.randint(k_e, (N,), 0, N))
    extra_dst = np.asarray(jax.random.randint(jax.random.fold_in(k_e, 1), (N,), 0, N))
    src = np.array(src + list(extra_src), dtype=np.int32)
    dst = np.array(dst + list(extra_dst), dtype=np.int32)

    # Adjacency built once: padded + bf16 (graph-construction time, not per call).
    adj_pad, tile = build_adjacency(src, dst, N)

    out = gcn_layer_forward(adj_pad, x, w, b, tile=tile)
    out = jax.block_until_ready(out)

    # Reference in f32 (original association: (A @ X) @ W.T + b).  Tolerance
    # loosened slightly for the bf16 XW intermediate (~2^-9 relative rounding).
    adj_true = np.zeros((N, N), dtype=np.float32)
    np.add.at(adj_true, (dst, src), 1.0)
    ref = adj_true @ np.asarray(x) @ np.asarray(w).T + np.asarray(b)
    np.testing.assert_allclose(np.asarray(out), ref, rtol=2e-2, atol=2e-2)

    print("KERNEL_OK")
</pallas_src>

<mosaic_0001>
module attributes {stable_mosaic.version = 11 : i64} {
  func.func @transform_kernel(%arg0: i32, %arg1: memref<128x32xf32, #tpu.memory_space<vmem>>, %arg2: memref<32x128xf32, #tpu.memory_space<vmem>>, %arg3: memref<128x128xbf16, #tpu.memory_space<vmem>>) attributes {dimension_semantics = [#tpu.dimension_semantics<parallel>], iteration_bounds = array<i64: 1>, scalar_prefetch = 0 : i64, scratch_operands = 0 : i64, tpu.core_type = #tpu.core_type<tc>, window_params = [{transform_indices = @transform_0, window_bounds = array<i64: 128, 32>}, {pipeline_mode = #tpu.pipeline_mode<synchronous>, transform_indices = @transform_1, window_bounds = array<i64: 32, 128>}, {transform_indices = @transform_2, window_bounds = array<i64: 128, 128>}]} {
    %c0 = arith.constant 0 : index
    %c0_0 = arith.constant 0 : index
    %0 = vector.load %arg1[%c0, %c0_0] : memref<128x32xf32, #tpu.memory_space<vmem>>, vector<128x32xf32>
    %c0_1 = arith.constant 0 : index
    %c0_2 = arith.constant 0 : index
    %1 = vector.load %arg2[%c0_1, %c0_2] : memref<32x128xf32, #tpu.memory_space<vmem>>, vector<32x128xf32>
    %cst = arith.constant dense<0.000000e+00> : vector<128x128xf32>
    %2 = tpu.matmul %0, %1, %cst {dimension_numbers = #tpu.dot_dimension_numbers<[1], [0], [0], [1], [0, 0, 1, 1], [], []>} : vector<128x32xf32>, vector<32x128xf32>, vector<128x128xf32> -> vector<128x128xf32>
    %3 = arith.truncf %2 : vector<128x128xf32> to vector<128x128xbf16>
    %c0_3 = arith.constant 0 : index
    %c0_4 = arith.constant 0 : index
    %4 = vector.load %arg3[%c0_3, %c0_4] : memref<128x128xbf16, #tpu.memory_space<vmem>>, vector<128x128xbf16>
    tpu.vector_store %arg3[%c0_3, %c0_4], %3 {strides = array<i32>} : memref<128x128xbf16, #tpu.memory_space<vmem>>, vector<128x128xbf16>,
    return
  }
  func.func @transform_0(%arg0: i32) -> (i32, i32) {
    %c0_i32 = arith.constant 0 : i32
    %c0_i32_0 = arith.constant 0 : i32
    return %arg0, %c0_i32 : i32, i32
  }
  func.func @transform_1(%arg0: i32) -> (i32, i32) {
    %c0_i32 = arith.constant 0 : i32
    %c0_i32_0 = arith.constant 0 : i32
    %c0_i32_1 = arith.constant 0 : i32
    return %c0_i32, %c0_i32_0 : i32, i32
  }
  func.func @transform_2(%arg0: i32) -> (i32, i32) {
    %c0_i32 = arith.constant 0 : i32
    %c0_i32_0 = arith.constant 0 : i32
    return %arg0, %c0_i32 : i32, i32
  }
}

</mosaic_0001>

<bundles_post_ra>
// kernel: tpu_custom_call.1
= control target key start
LH: loop header
LB: loop body
LE: loop exit
PB: predicated region body
PF: predicated region fallthrough
CT: control target
= control target key end

     0   :  { %vm32_vm0 = vcmask 261120   ;;  %s614_s0 = inlined_call_operand.vmem [shape: f32[128,32], index: 0, kind: input, shape index: {}]   ;;  %s615_s1 = inlined_call_operand.vmem [shape: f32[32,128], index: 1, kind: input, shape index: {}]   ;;  %s616_s2 = inlined_call_operand.hbm [shape: bf16[128,128], index: 2, kind: output, shape index: {}]  }
   0x1   :  { %v28_v0 = vld [vmem:[%s615_s1] sm:$0xff]  ;;  %v29_v1 = vld [vmem:[%s615_s1 + $0x8] sm:$0xff]  ;;  %v30_v2 = vld [vmem:[%s615_s1 + $0x10] sm:$0xff] }
   0x2   :  { %v469_v3 = vpack.c.bf16 %v29_v1, %v28_v0  ;;  %v31_v4 = vld [vmem:[%s615_s1 + $0x18] sm:$0xff]  ;;  %v12_v5 = vld [vmem:[%s614_s0] sm:$0xff] }
   0x3   :  { %v20_v6 = vld [vmem:[%s614_s0 + $0x40] sm:$0xff]  ;;  %v473_v7 = vpack.c.bf16 %v31_v4, %v30_v2  ;;  %445 = vmatprep.mubr.msk.f32.mxu0 %vm32_vm0, %v12_v5 }
   0x4   :  { %457 = vmatprep.mubr.msk.f32.mxu1 %vm32_vm0, %v20_v6  ;;  %470 = vmatprep.subr.bf16.mxu0 %v469_v3 }
   0x5   :  { %477 = vmatprep.subr.bf16.mxu1 %v469_v3  ;;  %472 = vmatpush3.bf16.msra.mxu0 %v469_v3 }
   0x6   :  { %479 = vmatpush3.bf16.msra.mxu1 %v469_v3  ;;  %474 = vmatprep.subr.bf16.mxu0 %v473_v7 }
   0x7   :  { %478 = vmatprep.subr.bf16.mxu1 %v473_v7 }
   0x8   :  { %7 = vsyncpa [#allocation3], 0  ;;  %v13_v8 = vld [vmem:[%s614_s0 + $0x8] sm:$0xff]  ;;  %v14_v10 = vld [vmem:[%s614_s0 + $0x10] sm:$0xff] }
   0x9   :  { %476 = vmatpush3.bf16.msra.mxu0 %v473_v7  ;;  %v21_v9 = vld [vmem:[%s614_s0 + $0x48] sm:$0xff]  ;;  %v22_v11 = vld [vmem:[%s614_s0 + $0x50] sm:$0xff]  ;;  %v15_v12 = vld [vmem:[%s614_s0 + $0x18] sm:$0xff] }
   0xa   :  { %480 = vmatpush3.bf16.msra.mxu1 %v473_v7  ;;  %v23_v13 = vld [vmem:[%s614_s0 + $0x58] sm:$0xff]  ;;  %v16_v14 = vld [vmem:[%s614_s0 + $0x20] sm:$0xff]  ;;  %v17_v16 = vld [vmem:[%s614_s0 + $0x28] sm:$0xff] }
   0xb   :  { %v24_v15 = vld [vmem:[%s614_s0 + $0x60] sm:$0xff]  ;;  %v25_v17 = vld [vmem:[%s614_s0 + $0x68] sm:$0xff]  ;;  %v18_v18 = vld [vmem:[%s614_s0 + $0x30] sm:$0xff] }
   0xc   :  { %446 = vmatmul.mubr.msk.f32.vlgmr.msra.gmra.mrb[0].mxu0 %vm32_vm0, %v13_v8  ;;  %v26_v19 = vld [vmem:[%s614_s0 + $0x70] sm:$0xff]  ;;  %v19_v20 = vld [vmem:[%s614_s0 + $0x38] sm:$0xff] }
   0xd   :  { %458 = vmatmul.mubr.msk.f32.vlgmr.msra.gmra.mrb[0].mxu1 %vm32_vm0, %v21_v9  ;;  %448 = vmatprep.mubr.msk.f32.mxu0 %vm32_vm0, %v14_v10  ;;  %v27_v21 = vld [vmem:[%s614_s0 + $0x78] sm:$0xff]  ;;  %s508_s0 = smov [#allocation2]  }
   0xe   :  { %460 = vmatprep.mubr.msk.f32.mxu1 %vm32_vm0, %v22_v11  ;;  %s311_s20 = sshll.u32 %s508_s0, 4  ;;  %s312_s20 = int_to_ptr.vmem [resolvable:$true] %s311_s20 }
   0xf   :  { %s484_s1 = scalar_lea.vmem %s312_s20, 1024  ;;  %p489_p1 = scmp.lt.s32.totalorder %s312_s20, %s312_s20 }
  0x10   :  { %449 = vmatmul.mubr.msk.f32.gmra.mrb[2].mxu0 %vm32_vm0, %v15_v12  ;;  %p485_p0 = scmp.ne.s32.totalorder %s312_s20, %s484_s1  ;;  %p490_p2 = scmp.lt.s32.totalorder %s484_s1, %s484_s1 }
  0x11   :  { %461 = vmatmul.mubr.msk.f32.gmra.mrb[2].mxu1 %vm32_vm0, %v23_v13  ;;  %451 = vmatprep.mubr.msk.f32.mxu0 %vm32_vm0, %v16_v14 }
  0x12   :  { %463 = vmatprep.mubr.msk.f32.mxu1 %vm32_vm0, %v24_v15  ;;  %p491_p3 = por %p490_p2, %p489_p1 }
  0x14   :  { %452 = vmatmul.mubr.msk.f32.gmra.mrb[4].mxu0 %vm32_vm0, %v17_v16  ;;  %p492_p4 = pnand %p491_p3, %p485_p0 }
  0x15   :  { %464 = vmatmul.mubr.msk.f32.gmra.mrb[4].mxu1 %vm32_vm0, %v25_v17  ;;  %454 = vmatprep.mubr.msk.f32.mxu0 %vm32_vm0, %v18_v18 }
  0x16   :  { %466 = vmatprep.mubr.msk.f32.mxu1 %vm32_vm0, %v26_v19 }
  0x18   :  { %455 = vmatmul.mubr.msk.f32.gmra.mrb[6].mxu0 %vm32_vm0, %v19_v20 }
  0x19   :  { %467 = vmatmul.mubr.msk.f32.gmra.mrb[6].mxu1 %vm32_vm0, %v27_v21 }
  0xdf   :  { %v447_v22 = vpop.f32.mrb[0].mxu0 }
  0xe0   :  { %v459_v23 = vpop.f32.mrb[0].mxu1  ;;  %v147_v24 = vpop.f32.mrb[1].mxu0 }
  0xe1   :  { %v187_v25 = vpop.f32.mrb[1].mxu1  ;;  %v373_v26 = vpack.c.bf16 %v447_v22, %v147_v24 }
  0xe2   :  { %v393_v27 = vpack.c.bf16 %v459_v23, %v187_v25 }
  0xe3   :  { %374 = vst [vmem:[#allocation2] sm:$0xff] %v373_v26   ;;  %v450_v28 = vpop.f32.mrb[2].mxu0 }
  0xe4   :  { %413 = vst [vmem:[#allocation2 + $0x20] sm:$0xff] %v393_v27   ;;  %v462_v29 = vpop.f32.mrb[2].mxu1  ;;  %v157_v30 = vpop.f32.mrb[3].mxu0 }
  0xe5   :  { %v197_v31 = vpop.f32.mrb[3].mxu1  ;;  %v378_v32 = vpack.c.bf16 %v450_v28, %v157_v30 }
  0xe6   :  { %v398_v33 = vpack.c.bf16 %v462_v29, %v197_v31 }
  0xe7   :  { %410 = vst [vmem:[#allocation2 + $0x8] sm:$0xff] %v378_v32   ;;  %v453_v34 = vpop.f32.mrb[4].mxu0 }
  0xe8   :  { %414 = vst [vmem:[#allocation2 + $0x28] sm:$0xff] %v398_v33   ;;  %v465_v35 = vpop.f32.mrb[4].mxu1  ;;  %v167_v36 = vpop.f32.mrb[5].mxu0 }
  0xe9   :  { %v207_v37 = vpop.f32.mrb[5].mxu1  ;;  %v383_v38 = vpack.c.bf16 %v453_v34, %v167_v36 }
  0xea   :  { %v403_v39 = vpack.c.bf16 %v465_v35, %v207_v37 }
  0xeb   :  { %411 = vst [vmem:[#allocation2 + $0x10] sm:$0xff] %v383_v38   ;;  %v456_v40 = vpop.f32.mrb[6].mxu0 }
  0xec   :  { %415 = vst [vmem:[#allocation2 + $0x30] sm:$0xff] %v403_v39   ;;  %v468_v41 = vpop.f32.mrb[6].mxu1  ;;  %v177_v42 = vpop.f32.mrb[7].mxu0 }
  0xed   :  { %v217_v43 = vpop.f32.mrb[7].mxu1  ;;  %v388_v44 = vpack.c.bf16 %v456_v40, %v177_v42 }
  0xee   :  { %v408_v45 = vpack.c.bf16 %v468_v41, %v217_v43 }
  0xef   :  { %412 = vst [vmem:[#allocation2 + $0x18] sm:$0xff] %v388_v44  }
  0xf0   :  { %416 = vst [vmem:[#allocation2 + $0x38] sm:$0xff] %v408_v45  }
  0xf1   :  { %495 = shalt.err (!%p492_p4)
}
  0xf2   :  { %s496_s23 = scalar_lea.hbm %s616_s2, 1024 }
  0xf3   :  { %p497_p5 = scmp.ne.s32.totalorder %s616_s2, %s496_s23  ;;  %p500_p6 = scmp.lt.u32.totalorder %s496_s23, %s616_s2 }
  0xf5   :  { %p502_p7 = pnand %p500_p6, %p497_p5 }
  0xf7   :  { %505 = shalt.err (!%p502_p7)
}
  0xf8   :  { %s509_s28 = smov 64   ;;  %s510_s29 = smov 4  }
  0xf9   :  { %317 = dma.vmem_to_hbm [thread:$0]  %s312_s20, 1024, %s616_s2, [#allocation3], %s509_s28, %s509_s28, %s510_s29  }
  0xfa   :  { %506 = dma.done.wait [#allocation3], 1024  }
  0xfb   :  { %507 = vsyncadd [#allocation3], 4294966272 }
  0xfc   :  { %321 = vsyncpa [#allocation3], 1 }

</bundles_post_ra>
